<compile_context>
chip_gen: v7x
topology: tpu7x:2x2x1
jax: 0.10.0
libtpu: 0.0.40
codegen_flags: <defaults>
</compile_context>

<pallas_src>
import functools

import jax
import jax.numpy as jnp
from jax import lax
from jax.experimental import pallas as pl
from jax.experimental.pallas import tpu as pltpu


def _mlp_kernel(x_ref, w1_ref, b1_ref, w2_ref, b2_ref, o_ref, *, out_is_vector):
    # h = relu(x @ W1.T + b1); W1 kept in PyTorch (hidden, in) layout, the MXU
    # consumes the transposed operand natively via dot_general.
    h = lax.dot_general(
        x_ref[...], w1_ref[...],
        dimension_numbers=(((1,), (1,)), ((), ())),
        preferred_element_type=jnp.float32)
    h = jnp.maximum(h + b1_ref[...], 0.0)

    if out_is_vector:
        # output_dim == 1: VPU multiply + lane reduction instead of an N=1
        # MXU matmul (w2_ref is (1, hidden), broadcast over batch rows).
        y = jnp.sum(h * w2_ref[...], axis=-1, keepdims=True) + b2_ref[...]
    else:
        y = lax.dot_general(
            h, w2_ref[...],
            dimension_numbers=(((1,), (1,)), ((), ())),
            preferred_element_type=jnp.float32) + b2_ref[...]

    o_ref[...] = y.astype(o_ref.dtype)


@functools.partial(jax.jit, static_argnames=("input_dim", "hidden_dim", "output_dim"))
def linear_mlp_forward(x, weights, *, input_dim, hidden_dim, output_dim):
    """Replicates LinearMLP.forward(x, weights).

    x:       (batch, input_dim) float32
    weights: flat (hidden*in + hidden + out*hidden + out,) float32,
             PyTorch layout [W1 (hid,in) row-major, b1, W2 (out,hid), b2]
    returns: (batch, output_dim) float32
    """
    batch = x.shape[0]

    # ---- glue (fused under jit): unpack flat weight vector, no transposes ----
    idx = 0
    w1 = weights[idx:idx + hidden_dim * input_dim].reshape(hidden_dim, input_dim)
    idx += hidden_dim * input_dim
    b1 = weights[idx:idx + hidden_dim].reshape(1, hidden_dim)
    idx += hidden_dim
    w2 = weights[idx:idx + output_dim * hidden_dim].reshape(output_dim, hidden_dim)
    idx += output_dim * hidden_dim
    b2 = weights[idx:idx + output_dim].reshape(1, output_dim)

    kernel = functools.partial(_mlp_kernel, out_is_vector=(output_dim == 1))
    out_shape = jax.ShapeDtypeStruct((batch, output_dim), jnp.float32)

    TB = 256  # batch tile for the scaled path (well under 64 MiB v7x VMEM)
    if batch % TB == 0 and batch // TB > 1:
        # Large-batch path: tile over batch, keep weights VMEM-resident,
        # batch axis "parallel" so v7x's two TensorCores split the work.
        return pl.pallas_call(
            kernel,
            out_shape=out_shape,
            grid=(batch // TB,),
            in_specs=[
                pl.BlockSpec((TB, input_dim), lambda i: (i, 0)),
                pl.BlockSpec((hidden_dim, input_dim), lambda i: (0, 0)),
                pl.BlockSpec((1, hidden_dim), lambda i: (0, 0)),
                pl.BlockSpec((output_dim, hidden_dim), lambda i: (0, 0)),
                pl.BlockSpec((1, output_dim), lambda i: (0, 0)),
            ],
            out_specs=pl.BlockSpec((TB, output_dim), lambda i: (i, 0)),
            compiler_params=pltpu.CompilerParams(
                dimension_semantics=("parallel",)),
        )(x, w1, b1, w2, b2)

    # Small-batch path: no grid, every operand a full-array VMEM block.
    vmem = pl.BlockSpec(memory_space=pltpu.MemorySpace.VMEM)
    return pl.pallas_call(
        kernel,
        out_shape=out_shape,
        in_specs=[vmem, vmem, vmem, vmem, vmem],
        out_specs=vmem,
    )(x, w1, b1, w2, b2)


def _reference(x, weights, *, input_dim, hidden_dim, output_dim):
    idx = 0
    w1 = weights[idx:idx + hidden_dim * input_dim].reshape(hidden_dim, input_dim)
    idx += hidden_dim * input_dim
    b1 = weights[idx:idx + hidden_dim]
    idx += hidden_dim
    w2 = weights[idx:idx + output_dim * hidden_dim].reshape(output_dim, hidden_dim)
    idx += output_dim * hidden_dim
    b2 = weights[idx:idx + output_dim]
    h = jnp.maximum(x @ w1.T + b1, 0.0)
    return h @ w2.T + b2


if __name__ == "__main__":
    # Module defaults; batch kept small.
    input_dim, hidden_dim, output_dim = 536, 64, 1
    batch = 8

    key = jax.random.PRNGKey(0)
    kx, kw = jax.random.split(key)
    x = jax.random.normal(kx, (batch, input_dim), dtype=jnp.float32)
    n_params = (hidden_dim * input_dim + hidden_dim
                + output_dim * hidden_dim + output_dim)
    weights = jax.random.normal(kw, (n_params,), dtype=jnp.float32) * 0.05

    out = linear_mlp_forward(
        x, weights,
        input_dim=input_dim, hidden_dim=hidden_dim, output_dim=output_dim)
    out = jax.block_until_ready(out)

    ref = _reference(
        x, weights,
        input_dim=input_dim, hidden_dim=hidden_dim, output_dim=output_dim)
    assert out.shape == (batch, output_dim)
    assert jnp.allclose(out, ref, atol=1e-4, rtol=1e-4)

    print("KERNEL_OK")
</pallas_src>

<mosaic_0001>
module attributes {stable_mosaic.version = 11 : i64} {
  func.func @_mlp_kernel(%arg0: memref<8x536xf32, #tpu.memory_space<vmem>>, %arg1: memref<64x536xf32, #tpu.memory_space<vmem>>, %arg2: memref<1x64xf32, #tpu.memory_space<vmem>>, %arg3: memref<1x64xf32, #tpu.memory_space<vmem>>, %arg4: memref<1x1xf32, #tpu.memory_space<vmem>>, %arg5: memref<8x1xf32, #tpu.memory_space<vmem>>) attributes {dimension_semantics = [], scalar_prefetch = 0 : i64, scratch_operands = 0 : i64, tpu.core_type = #tpu.core_type<tc>} {
    %c0 = arith.constant 0 : index
    %c0_0 = arith.constant 0 : index
    %0 = vector.load %arg0[%c0, %c0_0] : memref<8x536xf32, #tpu.memory_space<vmem>>, vector<8x536xf32>
    %c0_1 = arith.constant 0 : index
    %c0_2 = arith.constant 0 : index
    %1 = vector.load %arg1[%c0_1, %c0_2] : memref<64x536xf32, #tpu.memory_space<vmem>>, vector<64x536xf32>
    %cst = arith.constant dense<0.000000e+00> : vector<8x64xf32>
    %2 = tpu.matmul %0, %1, %cst {dimension_numbers = #tpu.dot_dimension_numbers<[1], [1], [0], [0], [0, 0, 1, 0], [], []>} : vector<8x536xf32>, vector<64x536xf32>, vector<8x64xf32> -> vector<8x64xf32>
    %c0_3 = arith.constant 0 : index
    %c0_4 = arith.constant 0 : index
    %3 = vector.load %arg2[%c0_3, %c0_4] : memref<1x64xf32, #tpu.memory_space<vmem>>, vector<1x64xf32>
    %4 = vector.broadcast %3 : vector<1x64xf32> to vector<8x64xf32>
    %5 = arith.addf %2, %4 : vector<8x64xf32>
    %cst_5 = arith.constant 0.000000e+00 : f32
    %6 = vector.broadcast %cst_5 : f32 to vector<8x64xf32>
    %7 = arith.maximumf %5, %6 : vector<8x64xf32>
    %c0_6 = arith.constant 0 : index
    %c0_7 = arith.constant 0 : index
    %8 = vector.load %arg3[%c0_6, %c0_7] : memref<1x64xf32, #tpu.memory_space<vmem>>, vector<1x64xf32>
    %9 = vector.broadcast %8 : vector<1x64xf32> to vector<8x64xf32>
    %10 = arith.mulf %7, %9 : vector<8x64xf32>
    %cst_8 = arith.constant dense<0.000000e+00> : vector<8xf32>
    %11 = vector.multi_reduction <add>, %10, %cst_8 [1] : vector<8x64xf32> to vector<8xf32>
    %12 = vector.shape_cast %11 : vector<8xf32> to vector<8x1xf32>
    %c0_9 = arith.constant 0 : index
    %c0_10 = arith.constant 0 : index
    %13 = vector.load %arg4[%c0_9, %c0_10] : memref<1x1xf32, #tpu.memory_space<vmem>>, vector<1x1xf32>
    %14 = vector.broadcast %13 : vector<1x1xf32> to vector<8x1xf32>
    %15 = arith.addf %12, %14 : vector<8x1xf32>
    %c0_11 = arith.constant 0 : index
    %c0_12 = arith.constant 0 : index
    %16 = vector.load %arg5[%c0_11, %c0_12] : memref<8x1xf32, #tpu.memory_space<vmem>>, vector<8x1xf32>
    tpu.vector_store %arg5[%c0_11, %c0_12], %15 {strides = array<i32>} : memref<8x1xf32, #tpu.memory_space<vmem>>, vector<8x1xf32>,
    return
  }
}

</mosaic_0001>

<bundles_post_ra>
// kernel: linear_mlp_forward.1
= control target key start
LH: loop header
LB: loop body
LE: loop exit
PB: predicated region body
PF: predicated region fallthrough
CT: control target
= control target key end

     0   :  { %v434_v49 = vmov 0.0|0.0   ;;  %vm74_vm0 = vcmask 195584   ;;  %vm435_vm2 = vmmov 0   ;;  %v436_v56 = vmov 0.0   ;;  %s629_s1 = inlined_call_operand.vmem [shape: f32[64,536], index: 1, kind: input, shape index: {}]   ;;  %s630_s0 = inlined_call_operand.vmem [shape: f32[8,536], index: 0, kind: input, shape index: {}]   ;;  %s631_s4 = inlined_call_operand.<no memory space> [shape: f32[1,1], index: 4, kind: input, shape index: {}]   ;;  %s632_s2 = inlined_call_operand.vmem [shape: f32[1,64], index: 2, kind: input, shape index: {}]   ;;  %s633_s3 = inlined_call_operand.vmem [shape: f32[1,64], index: 3, kind: input, shape index: {}]   ;;  %s634_s5 = inlined_call_operand.vmem [shape: f32[8,1], index: 5, kind: output, shape index: {}]  }
   0x1   :  { %v30_v0 = vld [vmem:[%s629_s1 + $0x18] sm:$0xff]  ;;  %v35_v1 = vld [vmem:[%s629_s1 + $0x40] sm:$0xff]  ;;  %v29_v2 = vld [vmem:[%s629_s1 + $0x10] sm:$0xff]  ;;  %vm321_vm3 = vcmask 523264   ;;  %vm333_vm4 = vcmask 7168  }
   0x2   :  { %v395_v3 = vpack.c.bf16 %v35_v1, %v30_v0  ;;  %v34_v4 = vld [vmem:[%s629_s1 + $0x38] sm:$0xff]  ;;  %v40_v5 = vld [vmem:[%s629_s1 + $0x68] sm:$0xff]  ;;  %v45_v6 = vld [vmem:[%s629_s1 + $0x90] sm:$0xff] }
   0x3   :  { %v397_v7 = vpack.c.bf16 %v34_v4, %v29_v2  ;;  %v399_v8 = vpack.c.bf16 %v45_v6, %v40_v5  ;;  %v39_v9 = vld [vmem:[%s629_s1 + $0x60] sm:$0xff]  ;;  %v44_v10 = vld [vmem:[%s629_s1 + $0x88] sm:$0xff]  ;;  %v50_v11 = vld [vmem:[%s629_s1 + $0xb8] sm:$0xff]  ;;  %v10_v4 = vstv %s631_s4 }
   0x4   :  { %396 = vmatprep.subr.bf16.mxu0 %v395_v3  ;;  %v55_v12 = vld [vmem:[%s629_s1 + $0xe0] sm:$0xff]  ;;  %v28_v13 = vld [vmem:[%s629_s1 + $0x8] sm:$0xff]  ;;  %v33_v14 = vld [vmem:[%s629_s1 + $0x30] sm:$0xff]  ;;  %v401_v20 = vpack.c.bf16 %v44_v10, %v39_v9  ;;  %11 = vst [vmem:[#allocation2] sm:$0x1] %v10_v4 }
   0x5   :  { %398 = vmatpush1.bf16.xpose.msra.mxu0 %v397_v7  ;;  %v379_v15 = vpack.c.bf16 %v33_v14, %v28_v13  ;;  %v27_v16 = vld [vmem:[%s629_s1] sm:$0xff]  ;;  %v32_v17 = vld [vmem:[%s629_s1 + $0x28] sm:$0xff]  ;;  %v25_v18 = vld [vmem:[%s630_s0 + $0x18] sm:$0xff]  ;;  %v403_v23 = vpack.c.bf16 %v55_v12, %v50_v11 }
   0x6   :  { %400 = vmatprep.subr.bf16.mxu0 %v399_v8  ;;  %v381_v19 = vpack.c.bf16 %v32_v17, %v27_v16  ;;  %236 = vmatprep.mubr.f32.mxu0 %v25_v18  ;;  %v38_v21 = vld [vmem:[%s629_s1 + $0x58] sm:$0xff]  ;;  %v43_v22 = vld [vmem:[%s629_s1 + $0x80] sm:$0xff]  ;;  %v37_v25 = vld [vmem:[%s629_s1 + $0x50] sm:$0xff] }
   0x7   :  { %380 = vmatprep.subr.bf16.mxu1 %v379_v15  ;;  %v383_v24 = vpack.c.bf16 %v43_v22, %v38_v21  ;;  %v42_v26 = vld [vmem:[%s629_s1 + $0x78] sm:$0xff]  ;;  %v48_v27 = vld [vmem:[%s629_s1 + $0xa8] sm:$0xff]  ;;  %v53_v28 = vld [vmem:[%s629_s1 + $0xd0] sm:$0xff] }
   0x8   :  { %382 = vmatpush1.bf16.xpose.msra.mxu1 %v381_v19  ;;  %v49_v29 = vld [vmem:[%s629_s1 + $0xb0] sm:$0xff]  ;;  %v54_v30 = vld [vmem:[%s629_s1 + $0xd8] sm:$0xff]  ;;  %v385_v31 = vpack.c.bf16 %v42_v26, %v37_v25  ;;  %v60_v32 = vld [vmem:[%s629_s1 + $0x108] sm:$0xff]  ;;  %v387_v34 = vpack.c.bf16 %v53_v28, %v48_v27 }
   0x9   :  { %384 = vmatprep.subr.bf16.mxu1 %v383_v24  ;;  %v65_v33 = vld [vmem:[%s629_s1 + $0x130] sm:$0xff]  ;;  %v23_v35 = vld [vmem:[%s630_s0 + $0x8] sm:$0xff]  ;;  %v405_v36 = vpack.c.bf16 %v54_v30, %v49_v29  ;;  %v47_v38 = vld [vmem:[%s629_s1 + $0xa0] sm:$0xff] }
   0xa   :  { %166 = vmatprep.mubr.f32.mxu1 %v23_v35  ;;  %v407_v37 = vpack.c.bf16 %v65_v33, %v60_v32  ;;  %v52_v39 = vld [vmem:[%s629_s1 + $0xc8] sm:$0xff]  ;;  %v58_v40 = vld [vmem:[%s629_s1 + $0xf8] sm:$0xff]  ;;  %v63_v41 = vld [vmem:[%s629_s1 + $0x120] sm:$0xff] }
   0xb   :  { %v59_v42 = vld [vmem:[%s629_s1 + $0x100] sm:$0xff]  ;;  %v64_v43 = vld [vmem:[%s629_s1 + $0x128] sm:$0xff]  ;;  %v389_v44 = vpack.c.bf16 %v52_v39, %v47_v38  ;;  %v391_v45 = vpack.c.bf16 %v63_v41, %v58_v40  ;;  %v57_v47 = vld [vmem:[%s629_s1 + $0xf0] sm:$0xff] }
   0xc   :  { %v409_v46 = vpack.c.bf16 %v64_v43, %v59_v42  ;;  %v62_v48 = vld [vmem:[%s629_s1 + $0x118] sm:$0xff]  ;;  %v31_v50 = vld [vmem:[%s629_s1 + $0x20] sm:$0xff]  ;;  %v36_v51 = vld [vmem:[%s629_s1 + $0x48] sm:$0xff] }
   0xd   :  { %402 = vmatpush1.bf16.xpose.msra.mxu0 %v401_v20  ;;  %v393_v52 = vpack.c.bf16 %v62_v48, %v57_v47  ;;  %v24_v53 = vld [vmem:[%s630_s0 + $0x10] sm:$0xff]  ;;  %v412_v54 = vpack.c.bf16 %v36_v51, %v31_v50  ;;  %vm580_vm1 = vmpackc.low %vm74_vm0, %vm74_vm0  ;;  %v46_v58 = vld [vmem:[%s629_s1 + $0x98] sm:$0xff] }
   0xe   :  { %404 = vmatprep.subr.bf16.mxu0 %v403_v23  ;;  %v41_v57 = vld [vmem:[%s629_s1 + $0x70] sm:$0xff]  ;;  %v22_v59 = vld [vmem:[%s630_s0] sm:$0xff]  ;;  %v56_v62 = vld [vmem:[%s629_s1 + $0xe8] sm:$0xff] }
   0xf   :  { %v416_v60 = vpack.c.bf16 %v46_v58, %v41_v57  ;;  %v51_v61 = vld [vmem:[%s629_s1 + $0xc0] sm:$0xff]  ;;  %v61_v0 = vld [vmem:[%s629_s1 + $0x110] sm:$0xff]  ;;  %v66_v1 = vld [vmem:[%s629_s1 + $0x138] sm:$0xff] }
  0x10   :  { %386 = vmatpush1.bf16.xpose.msra.mxu1 %v385_v31  ;;  %v420_v63 = vpack.c.bf16 %v56_v62, %v51_v61  ;;  %v424_v2 = vpack.c.bf16 %v66_v1, %v61_v0  ;;  %v26_v3 = vld [vmem:[%s630_s0 + $0x20] sm:$0xff] }
  0x11   :  { %388 = vmatprep.subr.bf16.mxu1 %v387_v34  ;;  %v339_v7 = vld [vmem:[%s632_s2] ss:$0 sm:$0xff] }
  0x12   :  { %v349_v12 = vld [vmem:[%s633_s3] ss:$0 sm:$0xff] }
  0x13   :  { %v350_v16 = vld [vmem:[#allocation2] ss:$0 sm:$0xff] }
  0x15   :  { %406 = vmatpush1.bf16.xpose.msra.mxu0 %v405_v36 }
  0x16   :  { %408 = vmatprep.subr.bf16.mxu0 %v407_v37 }
  0x18   :  { %390 = vmatpush1.bf16.xpose.msra.mxu1 %v389_v44 }
  0x19   :  { %392 = vmatprep.subr.bf16.mxu1 %v391_v45 }
  0x1d   :  { %410 = vmatpush1.bf16.xpose.msra.mxu0 %v409_v46 }
  0x1e   :  { %411 = vmatprep.subr.bf16.mxu0 %v434_v49 }
  0x20   :  { %394 = vmatpush1.bf16.xpose.msra.mxu1 %v393_v52 }
  0x24   :  { %237 = vmatmul.mubr.f32.vlgmr.msra.gmra.mrb[0].mxu0 %v24_v53 }
  0x25   :  { %414 = vmatpush3.bf16.xpose.msk.msra.mxu0 %vm580_vm1, %v412_v54  ;;  %376 = vmatprep.mubr.msk.f32.mxu0 %vm435_vm2, %v436_v56 }
  0x26   :  { %415 = vmatprep.subr.bf16.mxu0 %v434_v49 }
  0x27   :  { %167 = vmatmul.mubr.f32.vlgmr.msra.gmra.mrb[0].mxu1 %v22_v59 }
  0x2d   :  { %418 = vmatpush3.bf16.xpose.msk.msra.mxu0 %vm580_vm1, %v416_v60 }
  0x2e   :  { %419 = vmatprep.subr.bf16.mxu0 %v434_v49 }
  0x35   :  { %422 = vmatpush3.bf16.xpose.msk.msra.mxu0 %vm580_vm1, %v420_v63 }
  0x36   :  { %423 = vmatprep.subr.bf16.mxu0 %v434_v49 }
  0x3d   :  { %426 = vmatpush3.bf16.xpose.msk.msra.mxu0 %vm580_vm1, %v424_v2 }
  0x44   :  { %377 = vmatmul.mubr.msk.f32.vlgmr.msra.gmra.mrb[0].mxu0 %vm74_vm0, %v26_v3 }
  0xfa   :  { %v168_v5 = vpop.f32.mrb[0].mxu1 }
  0xfb   :  { %v170_v6 = vpop.f32.mrb[1].mxu1  ;;  %v169_v8 = vadd.f32 %v339_v7, %v168_v5 }
 0x117   :  { %v308_v9 = vpop.f32.mrb[0].mxu0 }
 0x118   :  { %v428_v10 = vadd.f32 %v308_v9, %v169_v8  ;;  %v378_v11 = vpop.f32.mrb[1].mxu0 }
 0x11a   :  { %v312_v13 = vmax.f32 %v428_v10, 0.0 }
 0x11c   :  { %v320_v14 = vmul.f32 %v349_v12, %v312_v13 }
 0x11e   :  { %v322_v15 = vsel %vm321_vm3, %v320_v14, 0.0 }
 0x11f   :  { %323 = vadd.xlane.f32.xlu0 %v322_v15 }
 0x1ac   :  { %v324_v17 = vpop.xlane.xlu0 %323 }
 0x1ad   :  { %v332_v18 = vadd.f32 %v350_v16, %v324_v17 }
 0x1af   :  { %334 = vst.msk [vmem:[%s634_s5] sm:$0xff] %vm333_vm4, %v332_v18 }

</bundles_post_ra>
